<compile_context>
chip_gen: v5e
topology: v5e:2x2
jax: 0.10.0
libtpu: 0.0.40
codegen_flags: <defaults>
</compile_context>

<pallas_src>
import numpy as np
import jax
import jax.numpy as jnp
from jax.experimental import pallas as pl
from jax.experimental.pallas import tpu as pltpu

SELU_ALPHA = 1.6732632423543772
SELU_SCALE = 1.0507009873554805
GN_EPS = 1e-5


def _selu(v):
    return SELU_SCALE * jnp.where(v > 0, v, SELU_ALPHA * jnp.expm1(jnp.minimum(v, 0.0)))


# --------------------------------------------------------------------------------------
# Pallas kernel 1: row-tiled fused GraphNorm affine + GCN linear transform
#   xl_block = (x_block * scale + shift) @ W1     (stored bf16)
# --------------------------------------------------------------------------------------
def graphnorm_linear_kernel(x_ref, scale_ref, shift_ref, w1_ref, o_ref):
    xn = x_ref[...] * scale_ref[...] + shift_ref[...]
    o_ref[...] = jnp.dot(xn, w1_ref[...],
                         preferred_element_type=jnp.float32).astype(o_ref.dtype)


# --------------------------------------------------------------------------------------
# Pallas kernel 2: GCN propagation + SELU + DMoN pooling, G graphs per grid step
# --------------------------------------------------------------------------------------
def gcn_dmon_kernel(xl_ref, adj_ref, cnt_ref, b1_ref, wm_ref, bm_ref,
                    logp_ref, st_ref, stat_ref):
    f32, bf16 = jnp.float32, jnp.bfloat16
    xl = xl_ref[...].astype(f32)          # [G, N, H]  (bf16 in HBM)
    adj = adj_ref[...]                    # [G, N, N]  bf16, adj[g, dst, src] -- never cast to f32
    cnt = cnt_ref[...]                    # [G, 1]     int32 per-graph node counts
    b1 = b1_ref[...]                      # [1, H]
    wm = wm_ref[...]                      # [H, C]
    bm = bm_ref[...]                      # [1, C]
    G, N, H = xl.shape
    C = wm.shape[1]

    def gsum(v):                          # [G, a, b] -> [G, 1]
        return jnp.sum(jnp.sum(v, axis=2), axis=1, keepdims=True)

    # Node-validity mask rebuilt from counts (replaces the old [G, N, 1] HBM stream).
    pos = jax.lax.broadcasted_iota(jnp.int32, (G, N, 1), 1)
    maskf = jnp.where(pos < cnt[:, :, None], 1.0, 0.0).astype(f32)        # [G, N, 1]

    # ---- GCNConv propagation (symmetric norm with self-loops on valid nodes) ----
    ones_col = jnp.ones((G, N, 1), bf16)
    deg_in = jnp.einsum('gds,gso->gdo', adj, ones_col,
                        preferred_element_type=f32)                        # exact f32 in-degrees
    deg = deg_in + maskf                                                   # + self loop
    dinv = jnp.where(deg > 0.0, jax.lax.rsqrt(deg), 0.0)                   # [G, N, 1]
    xs = (dinv * xl).astype(bf16)                                          # bf16 for the MXU
    msg = jnp.einsum('gds,gsh->gdh', adj, xs, preferred_element_type=f32)  # sum_s A[s->d] d_s^-1/2 xl_s
    h = _selu(dinv * msg + (dinv * dinv) * maskf * xl + b1) * maskf        # [G, N, H]

    # ---- DMoN cluster assignment: one tall matmul + masked softmax ----
    logits = jnp.dot(h.reshape(G * N, H), wm,
                     preferred_element_type=f32).reshape(G, N, C) + bm
    es = jnp.exp(logits - jnp.max(logits, axis=2, keepdims=True))
    s = es / jnp.sum(es, axis=2, keepdims=True)                            # exact divide
    s_m = s * maskf                                                        # [G, N, C]
    s_t = jnp.swapaxes(s_m, 1, 2)                                          # [G, C, N] lane-dense

    # ---- pooled features + log_softmax over hidden dim ----
    out = _selu(jnp.einsum('gcn,gnh->gch', s_t, h, preferred_element_type=f32))  # [G, C, H]
    omax = jnp.max(out, axis=2, keepdims=True)
    lse = jnp.log(jnp.sum(jnp.exp(out - omax), axis=2, keepdims=True)) + omax
    logp_ref[...] = out - lse
    st_ref[...] = s_t                                                      # lane-dense store

    # ---- spectral (modularity) loss ----
    as_ = jnp.einsum('gds,gsc->gdc', adj, s_m.astype(bf16),
                     preferred_element_type=f32)                           # [G, N, C]
    two_m = jnp.maximum(jnp.sum(deg_in, axis=1), 1e-12)                    # [G, 1] == 2*m
    inv_two_m = 1.0 / two_m                                                # exact, scalar-sized
    tr_out_adj = gsum(s_m * as_)                                           # trace(s^T A s)
    ones_n = jnp.ones((G, 1, N), f32)
    cavec = jnp.einsum('god,gdc->goc', ones_n, as_,
                       preferred_element_type=f32)                         # [G, 1, C] == deg^T s
    tr_norm = jnp.sum(cavec * cavec, axis=2) * inv_two_m                   # [G, 1]
    spectral = -(tr_out_adj - tr_norm) * inv_two_m                         # [G, 1]

    # ---- orthogonality loss: ||ss/||ss||_F - I/sqrt(C)||_F ----
    ss = jnp.einsum('gcn,gnd->gcd', s_t, s_m, preferred_element_type=f32)  # [G, C, C]
    tr_ss = gsum(s_m * s_m)
    fro_inv = jax.lax.rsqrt(jnp.maximum(gsum(ss * ss), 1e-30))
    ortho = jnp.sqrt(jnp.maximum(2.0 - 2.0 * (C ** -0.5) * tr_ss * fro_inv, 0.0))

    # ---- cluster-size statistics (combined across graphs in the wrapper) ----
    csize = jnp.einsum('gon,gnc->goc', ones_n, s_m, preferred_element_type=f32)   # [G, 1, C]
    cnorm = jnp.sqrt(jnp.sum(csize * csize, axis=2))                       # [G, 1]
    ncount = cnt.astype(f32)                                               # [G, 1]

    idx = jax.lax.broadcasted_iota(jnp.int32, (G, 4), 1)
    stats = (jnp.where(idx == 0, spectral, 0.0)
             + jnp.where(idx == 1, ortho, 0.0)
             + jnp.where(idx == 2, cnorm, 0.0)
             + jnp.where(idx == 3, ncount, 0.0))
    stat_ref[...] = stats.reshape(1, G, 4)


# --------------------------------------------------------------------------------------
# Glue: to_dense_batch / to_dense_adj equivalents (plain-JAX scatter)
# --------------------------------------------------------------------------------------
def densify(x, edge_index, batch, num_graphs, max_nodes):
    # `batch` is assumed sorted (standard PyG convention).
    n_total = x.shape[0]
    counts = jnp.zeros((num_graphs,), jnp.int32).at[batch].add(1)
    ptr = jnp.concatenate([jnp.zeros((1,), jnp.int32), jnp.cumsum(counts)])[:num_graphs]
    pos = jnp.arange(n_total, dtype=jnp.int32) - ptr[batch]
    x_d = jnp.zeros((num_graphs, max_nodes, x.shape[1]), jnp.float32).at[batch, pos].set(x)
    src, dst = edge_index[0], edge_index[1]
    # Adjacency stored PRE-TRANSPOSED ([b, dst, src]) so the kernel never transposes it,
    # and in bf16 (edge counts are small integers -> exact) to halve its HBM traffic.
    adj_t = jnp.zeros((num_graphs, max_nodes, max_nodes), jnp.bfloat16).at[
        batch[src], pos[dst], pos[src]].add(jnp.ones((src.shape[0],), jnp.bfloat16))
    return x_d, counts, adj_t


def _kernel2_vmem_limit_bytes(G, N, H, C):
    # Rough per-step working set: 2x-buffered pipeline blocks + in-kernel temporaries.
    lane = 128
    rnd = lambda v: ((v + lane - 1) // lane) * lane
    blk = (G * N * rnd(N) * 2        # adj (bf16)
           + G * N * rnd(H) * 2      # xl (bf16)
           + G * lane * 4            # counts
           + G * C * rnd(H) * 4      # logp out
           + G * C * rnd(N) * 4      # s_t out
           + G * lane * 4)           # stats
    temps = (G * N * rnd(H) * 4 * 4          # xl_f32 / xs / msg / h
             + G * N * rnd(C) * 4 * 3        # logits / s / as_
             + G * N * lane * 4 * 3)         # deg / dinv / maskf ([.,N,1] lane-padded)
    est = 2 * blk + temps + (4 << 20)
    # Clamp into a range that is legal on v5e/v6e (128 MiB physical) and v7x (64 MiB).
    return int(min(max(est, 32 << 20), 64 << 20))


# --------------------------------------------------------------------------------------
# Full Net.forward equivalent
# --------------------------------------------------------------------------------------
def net_forward(x, edge_index, batch, params, num_graphs, max_nodes,
                graphs_per_block=16, rows_per_block=1024):
    n_total, in_ch = x.shape
    hidden = params["w1"].shape[1]
    C = params["wm"].shape[1]
    N = max_nodes

    # ---- batch geometry: G graphs per grid step (keep G a multiple of 8 when blocked;
    #      sweep upward until the working set approaches the VMEM budget, smaller on v7x)
    G = min(num_graphs, graphs_per_block)
    if G < num_graphs:
        G = max(8, (G // 8) * 8)
    n_blocks = -(-num_graphs // G)
    Bpad = n_blocks * G

    x_d, counts, adj_t = densify(x, edge_index, batch, Bpad, N)
    cnt_d = counts.reshape(Bpad, 1)                                   # [Bpad, 1] int32

    # ---- GraphNorm statistics over all real nodes: tiny reduction, plain JAX ----
    mean = jnp.mean(x, axis=0, keepdims=True)                         # [1, F]
    cent = x - params["gn_mean_scale"] * mean
    var = jnp.mean(cent * cent, axis=0, keepdims=True)
    scale = params["gn_weight"] * jax.lax.rsqrt(var + GN_EPS)         # [1, F]
    shift = params["gn_bias"] - params["gn_mean_scale"] * mean * scale

    # ---- Kernel 1: row-tiled (x*scale + shift) @ W1, stored bf16 ----
    M = Bpad * N
    TM = max(8, (min(rows_per_block, M) // 8) * 8)
    nb1 = -(-M // TM)
    Mpad = nb1 * TM
    x_flat = x_d.reshape(M, in_ch)
    if Mpad != M:
        x_flat = jnp.pad(x_flat, ((0, Mpad - M), (0, 0)))
    xl_flat = pl.pallas_call(
        graphnorm_linear_kernel,
        out_shape=jax.ShapeDtypeStruct((Mpad, hidden), jnp.bfloat16),
        grid_spec=pltpu.PrefetchScalarGridSpec(
            num_scalar_prefetch=0,
            grid=(nb1,),
            in_specs=[pl.BlockSpec((TM, in_ch), lambda i: (i, 0)),
                      pl.BlockSpec((1, in_ch), lambda i: (0, 0)),
                      pl.BlockSpec((1, in_ch), lambda i: (0, 0)),
                      pl.BlockSpec((in_ch, hidden), lambda i: (0, 0))],
            out_specs=pl.BlockSpec((TM, hidden), lambda i: (i, 0))),
        compiler_params=pltpu.CompilerParams(dimension_semantics=("parallel",)),
    )(x_flat, scale, shift, params["w1"])
    # Padded rows hold garbage (shift @ W1); they are masked downstream via dinv/maskf.
    xl = xl_flat[:M].reshape(Bpad, N, hidden)

    # ---- Kernel 2: GCN propagation + SELU + DMoN pooling ----
    # NOTE: only add pipeline_mode=pl.Buffered(3) on the adj spec if profiling shows
    # exposed DMA after the VMEM savings (costs an extra G*N^2*2 bytes of VMEM).
    logp, s_t, stats = pl.pallas_call(
        gcn_dmon_kernel,
        out_shape=(
            jax.ShapeDtypeStruct((Bpad, C, hidden), jnp.float32),
            jax.ShapeDtypeStruct((Bpad, C, N), jnp.float32),         # lane-dense assignments
            jax.ShapeDtypeStruct((n_blocks, G, 4), jnp.float32),
        ),
        grid_spec=pltpu.PrefetchScalarGridSpec(
            num_scalar_prefetch=0,
            grid=(n_blocks,),
            in_specs=[
                pl.BlockSpec((G, N, hidden), lambda g: (g, 0, 0)),
                pl.BlockSpec((G, N, N), lambda g: (g, 0, 0)),
                pl.BlockSpec((G, 1), lambda g: (g, 0)),
                pl.BlockSpec((1, hidden), lambda g: (0, 0)),
                pl.BlockSpec((hidden, C), lambda g: (0, 0)),
                pl.BlockSpec((1, C), lambda g: (0, 0)),
            ],
            out_specs=[
                pl.BlockSpec((G, C, hidden), lambda g: (g, 0, 0)),
                pl.BlockSpec((G, C, N), lambda g: (g, 0, 0)),
                pl.BlockSpec((1, G, 4), lambda g: (g, 0, 0)),
            ],
        ),
        # Graphs are fully independent -> parallel grid (sharded across v7x's 2 TCs).
        compiler_params=pltpu.CompilerParams(
            dimension_semantics=("parallel",),
            vmem_limit_bytes=_kernel2_vmem_limit_bytes(G, N, hidden, C)),
    )(xl, adj_t, cnt_d, params["b1"], params["wm"], params["bm"])

    B = num_graphs
    stats = stats.reshape(Bpad, 4)
    spectral = jnp.mean(stats[:B, 0])
    ortho = jnp.mean(stats[:B, 1])
    cnorm_b = stats[:B, 2]
    ncount_b = stats[:B, 3]
    # Reproduces the literal PyTorch broadcasting in DMoN's cluster loss:
    # ([B]-norms / [B,1]-node-counts).mean() is a mean over a BxB matrix, which factorizes.
    cluster = (jnp.sqrt(jnp.float32(C))
               * jnp.mean(cnorm_b) * jnp.mean(1.0 / ncount_b) - 1.0)
    loss = spectral + ortho + cluster
    s = jnp.swapaxes(s_t[:B], 1, 2)                                   # back to [B, N, C]
    return logp[:B], loss, s


# --------------------------------------------------------------------------------------
# Pure-JAX reference (mirrors the torch_geometric semantics) for validation
# --------------------------------------------------------------------------------------
def reference_forward(x, edge_index, batch, params, num_graphs, max_nodes):
    n_total, in_ch = x.shape
    hidden = params["w1"].shape[1]
    C = params["wm"].shape[1]
    B, N = num_graphs, max_nodes

    gw, gb, gms = params["gn_weight"][0], params["gn_bias"][0], params["gn_mean_scale"][0]
    mean = jnp.mean(x, axis=0, keepdims=True)
    cent = x - gms * mean
    var = jnp.mean(cent * cent, axis=0, keepdims=True)
    xn = gw * cent / jnp.sqrt(var + GN_EPS) + gb

    xl = xn @ params["w1"]
    src, dst = edge_index[0], edge_index[1]
    deg = jnp.zeros((n_total,), jnp.float32).at[dst].add(1.0) + 1.0
    dinv = 1.0 / jnp.sqrt(deg)
    w_e = dinv[src] * dinv[dst]
    agg = jnp.zeros((n_total, hidden), jnp.float32).at[dst].add(w_e[:, None] * xl[src])
    agg = agg + (dinv * dinv)[:, None] * xl
    h = jax.nn.selu(agg + params["b1"][0])

    h_d, counts, adj_t = densify(h, edge_index, batch, B, N)
    mask = (jnp.arange(N)[None, :] < counts[:, None]).astype(jnp.float32)
    maskf = mask[..., None]
    adj = jnp.transpose(adj_t, (0, 2, 1)).astype(jnp.float32)         # back to [b, src, dst]
    s = jax.nn.softmax(h_d @ params["wm"] + params["bm"][0], axis=-1)
    x_m = h_d * maskf
    s_m = s * maskf
    out = jax.nn.selu(jnp.einsum('bnc,bnh->bch', s_m, x_m))
    out_adj = jnp.einsum('bnc,bnm,bmd->bcd', s_m, adj, s_m)

    degrees = jnp.sum(adj, axis=2, keepdims=True) * maskf
    m = jnp.sum(degrees, axis=(1, 2)) / 2.0
    ca = jnp.einsum('bnc,bnk->bck', s_m, degrees)
    cb = jnp.einsum('bnk,bnc->bkc', degrees, s_m)
    normalizer = jnp.matmul(ca, cb) / 2.0 / m[:, None, None]
    decompose = out_adj - normalizer
    spectral = jnp.mean(-jnp.trace(decompose, axis1=1, axis2=2) / 2.0 / m)

    ss = jnp.einsum('bnc,bnd->bcd', s_m, s_m)
    ss_fro = jnp.sqrt(jnp.sum(ss ** 2, axis=(1, 2), keepdims=True))
    eye = jnp.eye(C, dtype=jnp.float32)
    ortho = jnp.mean(jnp.sqrt(jnp.sum(
        (ss / ss_fro - eye / jnp.sqrt(jnp.float32(C))) ** 2, axis=(1, 2))))

    csize = jnp.sum(s_m, axis=1)
    cnorm = jnp.sqrt(jnp.sum(csize ** 2, axis=1))     # [B]
    nsum = jnp.sum(maskf, axis=1)                     # [B, 1]
    cluster = jnp.mean(cnorm / nsum * jnp.sqrt(jnp.float32(C)) - 1.0)  # literal torch broadcast

    logp = jax.nn.log_softmax(out, axis=-1)
    return logp, spectral + ortho + cluster, s_m


if __name__ == "__main__":
    in_ch, hidden, n_clusters = 8, 32, 4
    n0, n1 = 5, 7
    n_total = n0 + n1
    B, Nmax = 2, 8

    key = jax.random.PRNGKey(0)
    kx, kw1, kwm, kbm = jax.random.split(key, 4)

    # Deterministic synthetic parameters (GraphNorm uses its canonical init).
    params = {
        "gn_weight": jnp.ones((1, in_ch), jnp.float32),
        "gn_bias": jnp.zeros((1, in_ch), jnp.float32),
        "gn_mean_scale": jnp.ones((1, in_ch), jnp.float32),
        "w1": jax.random.normal(kw1, (in_ch, hidden), jnp.float32) / jnp.sqrt(jnp.float32(in_ch)),
        "b1": jnp.zeros((1, hidden), jnp.float32),
        "wm": jax.random.normal(kwm, (hidden, n_clusters), jnp.float32) / jnp.sqrt(jnp.float32(hidden)),
        "bm": 0.1 * jax.random.normal(kbm, (1, n_clusters), jnp.float32),
    }

    x = jax.random.normal(kx, (n_total, in_ch), jnp.float32)
    batch = jnp.array([0] * n0 + [1] * n1, jnp.int32)
    edges = []
    for i in range(n0):                                  # undirected ring in graph 0
        edges.append((i, (i + 1) % n0)); edges.append(((i + 1) % n0, i))
    for i in range(n1):                                  # undirected ring in graph 1
        edges.append((n0 + i, n0 + (i + 1) % n1)); edges.append((n0 + (i + 1) % n1, n0 + i))
    edge_index = jnp.array(edges, jnp.int32).T           # [2, 24]

    logp, loss, s = net_forward(x, edge_index, batch, params, B, Nmax)
    jax.block_until_ready((logp, loss, s))

    logp_r, loss_r, s_r = reference_forward(x, edge_index, batch, params, B, Nmax)
    np.testing.assert_allclose(np.asarray(logp), np.asarray(logp_r), rtol=5e-3, atol=5e-3)
    np.testing.assert_allclose(np.asarray(s), np.asarray(s_r), rtol=5e-3, atol=5e-3)
    np.testing.assert_allclose(np.asarray(loss), np.asarray(loss_r), rtol=5e-3, atol=5e-3)

    print("KERNEL_OK")
</pallas_src>

<mosaic_0001>
module attributes {stable_mosaic.version = 11 : i64} {
  func.func @graphnorm_linear_kernel(%arg0: i32, %arg1: memref<16x8xf32, #tpu.memory_space<vmem>>, %arg2: memref<1x8xf32, #tpu.memory_space<vmem>>, %arg3: memref<1x8xf32, #tpu.memory_space<vmem>>, %arg4: memref<8x32xf32, #tpu.memory_space<vmem>>, %arg5: memref<16x32xbf16, #tpu.memory_space<vmem>>) attributes {dimension_semantics = [#tpu.dimension_semantics<parallel>], iteration_bounds = array<i64: 1>, scalar_prefetch = 0 : i64, scratch_operands = 0 : i64, tpu.core_type = #tpu.core_type<tc>, window_params = [{transform_indices = @transform_0, window_bounds = array<i64: 16, 8>}, {pipeline_mode = #tpu.pipeline_mode<synchronous>, transform_indices = @transform_1, window_bounds = array<i64: 1, 8>}, {pipeline_mode = #tpu.pipeline_mode<synchronous>, transform_indices = @transform_2, window_bounds = array<i64: 1, 8>}, {pipeline_mode = #tpu.pipeline_mode<synchronous>, transform_indices = @transform_3, window_bounds = array<i64: 8, 32>}, {transform_indices = @transform_4, window_bounds = array<i64: 16, 32>}]} {
    %c0 = arith.constant 0 : index
    %c0_0 = arith.constant 0 : index
    %0 = vector.load %arg1[%c0, %c0_0] : memref<16x8xf32, #tpu.memory_space<vmem>>, vector<16x8xf32>
    %c0_1 = arith.constant 0 : index
    %c0_2 = arith.constant 0 : index
    %1 = vector.load %arg2[%c0_1, %c0_2] : memref<1x8xf32, #tpu.memory_space<vmem>>, vector<1x8xf32>
    %2 = vector.broadcast %1 : vector<1x8xf32> to vector<16x8xf32>
    %3 = arith.mulf %0, %2 : vector<16x8xf32>
    %c0_3 = arith.constant 0 : index
    %c0_4 = arith.constant 0 : index
    %4 = vector.load %arg3[%c0_3, %c0_4] : memref<1x8xf32, #tpu.memory_space<vmem>>, vector<1x8xf32>
    %5 = vector.broadcast %4 : vector<1x8xf32> to vector<16x8xf32>
    %6 = arith.addf %3, %5 : vector<16x8xf32>
    %c0_5 = arith.constant 0 : index
    %c0_6 = arith.constant 0 : index
    %7 = vector.load %arg4[%c0_5, %c0_6] : memref<8x32xf32, #tpu.memory_space<vmem>>, vector<8x32xf32>
    %cst = arith.constant dense<0.000000e+00> : vector<16x32xf32>
    %8 = tpu.matmul %6, %7, %cst {dimension_numbers = #tpu.dot_dimension_numbers<[1], [0], [0], [1], [0, 0, 1, 1], [], []>} : vector<16x8xf32>, vector<8x32xf32>, vector<16x32xf32> -> vector<16x32xf32>
    %9 = arith.truncf %8 : vector<16x32xf32> to vector<16x32xbf16>
    %c0_7 = arith.constant 0 : index
    %c0_8 = arith.constant 0 : index
    %10 = vector.load %arg5[%c0_7, %c0_8] : memref<16x32xbf16, #tpu.memory_space<vmem>>, vector<16x32xbf16>
    tpu.vector_store %arg5[%c0_7, %c0_8], %9 {strides = array<i32>} : memref<16x32xbf16, #tpu.memory_space<vmem>>, vector<16x32xbf16>,
    return
  }
  func.func @transform_0(%arg0: i32) -> (i32, i32) {
    %c0_i32 = arith.constant 0 : i32
    %c0_i32_0 = arith.constant 0 : i32
    return %arg0, %c0_i32 : i32, i32
  }
  func.func @transform_1(%arg0: i32) -> (i32, i32) {
    %c0_i32 = arith.constant 0 : i32
    %c0_i32_0 = arith.constant 0 : i32
    %c0_i32_1 = arith.constant 0 : i32
    return %c0_i32, %c0_i32_0 : i32, i32
  }
  func.func @transform_2(%arg0: i32) -> (i32, i32) {
    %c0_i32 = arith.constant 0 : i32
    %c0_i32_0 = arith.constant 0 : i32
    %c0_i32_1 = arith.constant 0 : i32
    return %c0_i32, %c0_i32_0 : i32, i32
  }
  func.func @transform_3(%arg0: i32) -> (i32, i32) {
    %c0_i32 = arith.constant 0 : i32
    %c0_i32_0 = arith.constant 0 : i32
    %c0_i32_1 = arith.constant 0 : i32
    return %c0_i32, %c0_i32_0 : i32, i32
  }
  func.func @transform_4(%arg0: i32) -> (i32, i32) {
    %c0_i32 = arith.constant 0 : i32
    %c0_i32_0 = arith.constant 0 : i32
    return %arg0, %c0_i32 : i32, i32
  }
}

</mosaic_0001>

<bundles_post_ra>
// kernel: tpu_custom_call.1
= control target key start
LH: loop header
LB: loop body
LE: loop exit
PB: predicated region body
PF: predicated region fallthrough
CT: control target
= control target key end

     0   :  { %s166_s0 = inlined_call_operand.vmem [shape: f32[16,8], index: 0, kind: input, shape index: {}]   ;;  %s167_s1 = inlined_call_operand.vmem [shape: f32[1,8], index: 1, kind: input, shape index: {}]   ;;  %s168_s2 = inlined_call_operand.vmem [shape: f32[1,8], index: 2, kind: input, shape index: {}]   ;;  %s169_s3 = inlined_call_operand.vmem [shape: f32[8,32], index: 3, kind: input, shape index: {}]   ;;  %s170_s4 = inlined_call_operand.hbm [shape: bf16[16,32], index: 4, kind: output, shape index: {}]  }
   0x1   :  { %v32_v0 = vld [vmem:[%s169_s3] sm:$0xff]  ;;  %v19_v4 = vld [vmem:[%s166_s0 + $0x8] sm:$0xff] }
   0x2   :  { %v18_v1 = vld [vmem:[%s166_s0] sm:$0xff]  ;;  %55 = vmatpush.msra.mxu0 %v32_v0  ;;  %88 = vmatpush.msra.mxu1 %v32_v0 }
   0x3   :  { %v92_v2 = vld [vmem:[%s167_s1] ss:$0 sm:$0xff] }
   0x4   :  { %v93_v3 = vld [vmem:[%s168_s2] ss:$0 sm:$0xff] }
   0x5   :  { %9 = vsyncpa [#allocation3], 0  ;;  %v24_v5 = vmul.f32 %v92_v2, %v18_v1  ;;  %v25_v6 = vmul.f32 %v92_v2, %v19_v4  ;;  %vm33_vm0 = vcmask 64512   ;;  %s120_s3 = smov [#allocation2]   ;;  %s74_s27 = sshll.u32 %s170_s4, 4  ;;  %vm65_vm1 = vcmask 257024   ;;  %s75_s27 = int_to_ptr.hbm [resolvable:$true] %s74_s27 }
   0x6   :  { %s72_s25 = sshll.u32 %s120_s3, 4  ;;  %s121_s0 = smov 64   ;;  %s73_s25 = int_to_ptr.vmem [resolvable:$true] %s72_s25 }
   0x7   :  { %v30_v7 = vadd.f32 %v93_v3, %v24_v5  ;;  %v31_v8 = vadd.f32 %v93_v3, %v25_v6  ;;  %s122_s2 = smov 4  }
   0x9   :  { %86 = vmatmul.msk.f32.vlgmr.msra.gmra.mxu0 %vm33_vm0, %v30_v7  ;;  %87 = vmatmul.msk.f32.vlgmr.msra.gmra.mxu1 %vm33_vm0, %v31_v8 }
  0x86   :  { %v57_v9 = vpop.f32.mrf.mxu0  ;;  %v60_v10 = vpop.f32.mrf.mxu1 }
  0x87   :  { %v63_v11 = vpack.c.bf16 %v57_v9, %v57_v9  ;;  %v64_v12 = vpack.c.bf16 %v60_v10, %v60_v10 }
  0x89   :  { %66 = vst.msk [vmem:[#allocation2] sm:$0xf] %vm65_vm1, %v63_v11 }
  0x8a   :  { %67 = vst.msk [vmem:[#allocation2 + $0x4] sm:$0xf] %vm65_vm1, %v64_v12 }
  0x8b   :  { %80 = dma.vmem_to_hbm [thread:$0]  %s73_s25, 128, %s75_s27, [#allocation3], %s121_s0, %s121_s0, %s122_s2  }
  0x8c   :  { %118 = dma.done.wait [#allocation3], 128  }
  0x8d   :  { %119 = vsyncadd [#allocation3], 4294967168 }
  0x8e   :  { %85 = vsyncpa [#allocation3], 1 }

</bundles_post_ra>
